<compile_context>
chip_gen: v5e
topology: v5e:2x2
jax: 0.10.0
libtpu: 0.0.40
codegen_flags: <defaults>
</compile_context>

<pallas_src>
import math
from functools import partial

import numpy as np
import jax
import jax.numpy as jnp
from jax.experimental import pallas as pl
from jax.experimental.pallas import tpu as pltpu


_LANE = 128
_SUBLANE = 8


def _round_up(x, m):
    return (x + m - 1) // m * m


def _round_down(x, m):
    return (x // m) * m


# --------------------------------------------------------------------------
# Kernels
# --------------------------------------------------------------------------
def _soft_ce_soft_kernel(x_ref, t_ref, o_ref):
    """Soft (already-distributional) targets: both softmaxes in-kernel."""
    x = x_ref[...].astype(jnp.float32)
    t = t_ref[...].astype(jnp.float32)

    # -log_softmax(x) along the class (lane) axis; one exp per element.
    x_max = jnp.max(x, axis=-1, keepdims=True)
    x_sh = x - x_max
    lse = jnp.log(jnp.sum(jnp.exp(x_sh), axis=-1, keepdims=True))
    neg_logp = lse - x_sh                       # = -log_softmax(x)

    # softmax(t) kept factored as t_exp * recip(denom); sign fused into neg_logp.
    t_max = jnp.max(t, axis=-1, keepdims=True)
    t_exp = jnp.exp(t - t_max)
    t_den = jnp.sum(t_exp, axis=-1, keepdims=True)
    # EUP approximate reciprocal + one Newton step on the tiny (tn,1) column.
    r = pl.reciprocal(t_den, approx=True)
    r = r * (2.0 - t_den * r)

    # TODO(synk): on v7x a bf16 EUP exp for t_exp (+ bf16 epilogue) would lift
    # the EUP ceiling at the 3.2 TB/s roofline; kept f32 for v5e-safe code.
    o_ref[...] = (t_exp * neg_logp * r).astype(o_ref.dtype)


def _soft_ce_int_kernel(x_ref, idx_ref, o_ref, *, num_classes,
                        low_precision_epilogue):
    """Integer class-index targets: softmax(one_hot) computed analytically."""
    x = x_ref[...].astype(jnp.float32)

    x_max = jnp.max(x, axis=-1, keepdims=True)
    x_sh = x - x_max
    lse = jnp.log(jnp.sum(jnp.exp(x_sh), axis=-1, keepdims=True))
    neg_logp = lse - x_sh                       # = -log_softmax(x)

    # softmax over a one-hot row has only two values:
    #   p_true = e / (e + C - 1),  p_other = 1 / (e + C - 1)
    denom = math.e + (num_classes - 1)
    p_true = math.e / denom
    p_other = 1.0 / denom

    idx = idx_ref[...]                          # (tn, 1) int32
    col = jax.lax.broadcasted_iota(jnp.int32, x.shape, dimension=1)
    hit = col == idx

    if low_precision_epilogue:
        # >= v6e with 16-bit output: do the select + multiply packed in the
        # output dtype (the f32->out cast is needed anyway for the store).
        odt = o_ref.dtype
        p = jnp.where(hit, jnp.asarray(p_true, dtype=odt),
                      jnp.asarray(p_other, dtype=odt))
        o_ref[...] = (p * neg_logp.astype(odt)).astype(odt)
    else:
        p = jnp.where(hit, jnp.float32(p_true), jnp.float32(p_other))
        o_ref[...] = (p * neg_logp).astype(o_ref.dtype)


# --------------------------------------------------------------------------
# Hardware heuristics
# --------------------------------------------------------------------------
def _tpu_info():
    """Best-effort (vmem_capacity_bytes, tensorcores_per_chip, gen>=6)."""
    kind = ""
    try:
        kind = jax.devices()[0].device_kind.lower()
    except Exception:
        pass
    is_v7 = ("7x" in kind) or ("v7" in kind)
    gen_ge_6 = is_v7 or ("v6" in kind)
    vmem_bytes = (64 << 20) if is_v7 else (128 << 20)
    num_tc = 2 if is_v7 else 1
    try:
        # Take the min with the heuristic so a chip-level (not per-TC) number
        # can never make us over-budget on v7x.
        vmem_bytes = min(vmem_bytes, int(pltpu.get_tpu_info().vmem_capacity_bytes))
    except Exception:
        pass
    return vmem_bytes, num_tc, gen_ge_6


def _row_alignment(*dtypes):
    """Sublane packing granularity for the streamed dtypes (8/16/32 rows)."""
    align = _SUBLANE
    for dt in dtypes:
        sz = np.dtype(dt).itemsize
        if sz == 2:
            align = max(align, 16)
        elif sz == 1:
            align = max(align, 32)
    return align


def _pick_block_rows(n, c, in_bytes, t_bytes, out_bytes, *, row_align,
                     int_path, vmem_tile_budget, min_steps, num_tc):
    """Row tile: big enough to saturate HBM, small enough to pipeline."""
    if n <= row_align:
        return n                                  # full extent, always legal

    # VMEM footprint uses the lane-padded width; streams are double-buffered;
    # the int path has no target tile and fewer live f32 temporaries.
    c_vmem = _round_up(c, _LANE)
    n_temps = 3 if int_path else 6
    per_row = max(1, c_vmem * (2 * (in_bytes + t_bytes + out_bytes) + n_temps * 4))
    tn = max(row_align, _round_down(vmem_tile_budget // per_row, row_align))

    # Aim for >= min_steps grid steps (pipeline overlap; >=3-4 per v7x TC),
    # but never shrink a step's streamed HBM bytes below ~2 MiB.
    stream_bytes_per_row = max(1, c * (in_bytes + t_bytes + out_bytes))
    bw_floor_rows = _round_up(max(row_align, (2 << 20) // stream_bytes_per_row),
                              row_align)
    steps_cap = _round_up(pl.cdiv(n, min_steps), row_align)
    tn = min(tn, max(steps_cap, bw_floor_rows))

    # Multi-TensorCore chips (v7x): always give every core at least one step.
    if num_tc > 1:
        tn = min(tn, _round_up(pl.cdiv(n, num_tc), row_align))

    tn = min(tn, _round_up(n, row_align))
    return max(tn, row_align)


# --------------------------------------------------------------------------
# Wrapper
# --------------------------------------------------------------------------
def soft_cross_entropy_loss(inp, target, smoothing=0.0, reduction="mean",
                            *, out_dtype=None, block_rows=None,
                            vmem_limit_bytes=None):
    """Pallas forward of SoftCrossEntropyLoss.

    inp:    (N, C) logits (any float dtype; math is f32 inside the kernel)
    target: (N,) integer class indices OR (N, C) soft targets
    Returns the UNREDUCED elementwise loss, shape (N, C), dtype out_dtype
    (defaults to inp.dtype). `smoothing`/`reduction` are accepted for API
    parity but — like the reference forward — unused.
    """
    del smoothing, reduction  # reference forward never uses them
    assert inp.ndim == 2, "expected (N, C) logits"
    n, c = inp.shape
    out_dtype = inp.dtype if out_dtype is None else jnp.dtype(out_dtype)

    vmem_cap, num_tc, gen_ge_6 = _tpu_info()
    if vmem_limit_bytes is None:
        # ~60% of physical VMEM: ~38 MiB on v7x (64 MiB/TC), 64 MiB on v5e/v6e.
        vmem_limit_bytes = max(16 << 20, min(64 << 20, int(vmem_cap * 0.6)))
    tile_budget = int(vmem_limit_bytes * 0.4)

    int_target = (target.ndim == 1)

    if int_target:
        # No (N, C) one-hot materialized in HBM: stream the raw indices.
        t_in = target.astype(jnp.int32).reshape(n, 1)
        t_bytes = 0  # (tn, 1) int32 side stream is negligible HBM traffic
        low_prec = bool(gen_ge_6 and np.dtype(out_dtype).itemsize == 2)
        kernel = partial(_soft_ce_int_kernel, num_classes=c,
                         low_precision_epilogue=low_prec)
        row_align = _row_alignment(inp.dtype, out_dtype)
    else:
        assert target.shape == (n, c), "soft target must match logits shape"
        t_in = target
        t_bytes = np.dtype(t_in.dtype).itemsize
        kernel = _soft_ce_soft_kernel
        row_align = _row_alignment(inp.dtype, out_dtype, t_in.dtype)

    if block_rows is None:
        tn = _pick_block_rows(n, c,
                              np.dtype(inp.dtype).itemsize, t_bytes,
                              np.dtype(out_dtype).itemsize,
                              row_align=row_align, int_path=int_target,
                              vmem_tile_budget=tile_budget,
                              min_steps=4 * num_tc, num_tc=num_tc)
    else:
        tn = min(int(block_rows), n)
        if tn != n:
            tn = max(_SUBLANE, _round_down(tn, _SUBLANE))

    # Ragged last row-block: grid = cdiv(n, tn) may read rows >= N in the last
    # step.  This is safe here because all reductions are along the class axis
    # (no cross-row contamination) and Pallas masks the out-of-bounds writes.
    grid = (pl.cdiv(n, tn),)

    # Full-extent (unpadded) class axis: legal even when C % 128 != 0, and it
    # avoids any wrapper-side pad / slice HBM round-trips.
    x_spec = pl.BlockSpec((tn, c), lambda i: (i, 0))
    t_spec = pl.BlockSpec((tn, 1), lambda i: (i, 0)) if int_target else \
        pl.BlockSpec((tn, c), lambda i: (i, 0))
    o_spec = pl.BlockSpec((tn, c), lambda i: (i, 0))

    out = pl.pallas_call(
        kernel,
        out_shape=jax.ShapeDtypeStruct((n, c), out_dtype),
        grid_spec=pltpu.PrefetchScalarGridSpec(
            num_scalar_prefetch=0,
            grid=grid,
            in_specs=[x_spec, t_spec],
            out_specs=o_spec,
        ),
        compiler_params=pltpu.CompilerParams(
            dimension_semantics=("parallel",),
            vmem_limit_bytes=vmem_limit_bytes,
        ),
    )(inp, t_in)
    return out


# --------------------------------------------------------------------------
# Pure-JAX reference + demo
# --------------------------------------------------------------------------
def _reference(inp, target):
    num_classes = inp.shape[1]
    if target.ndim == 1:
        target = jax.nn.one_hot(target, num_classes, dtype=jnp.float32)
    logprobs = jax.nn.log_softmax(inp.astype(jnp.float32), axis=1)
    return -(jax.nn.softmax(target.astype(jnp.float32), axis=1) * logprobs)


if __name__ == "__main__":
    key = jax.random.PRNGKey(0)
    k1, k2, k3, k4, k5 = jax.random.split(key, 5)

    # Case 1 & 2: lane-aligned class count, int + soft targets.
    N, C = 8, 128
    logits = jax.random.normal(k1, (N, C), dtype=jnp.float32)
    tgt_int = jax.random.randint(k2, (N,), 0, C, dtype=jnp.int32)
    tgt_soft = jax.random.normal(k3, (N, C), dtype=jnp.float32)

    out_int = jax.block_until_ready(soft_cross_entropy_loss(logits, tgt_int))
    out_soft = jax.block_until_ready(soft_cross_entropy_loss(logits, tgt_soft))

    ref_int = _reference(logits, tgt_int)
    ref_soft = _reference(logits, tgt_soft)
    assert out_int.shape == (N, C) and out_soft.shape == (N, C)
    assert jnp.allclose(out_int, ref_int, atol=2e-5, rtol=2e-5)
    assert jnp.allclose(out_soft, ref_soft, atol=2e-5, rtol=2e-5)

    # Case 3: non-multiple-of-128 class count — now fed unpadded (no wrapper
    # pad / output slice); BlockSpec uses the full class extent.
    N2, C2 = 16, 100
    logits2 = jax.random.normal(k4, (N2, C2), dtype=jnp.float32)
    tgt2 = jax.random.randint(k5, (N2,), 0, C2, dtype=jnp.int32)
    out2 = jax.block_until_ready(soft_cross_entropy_loss(logits2, tgt2))
    assert out2.shape == (N2, C2)
    assert jnp.allclose(out2, _reference(logits2, tgt2), atol=2e-5, rtol=2e-5)

    # Case 4: bf16 logits stay bf16 on the HBM wire, output comes back bf16
    # (packed low-precision epilogue on >= v6e).
    logits_bf16 = logits.astype(jnp.bfloat16)
    out_bf16 = jax.block_until_ready(soft_cross_entropy_loss(logits_bf16, tgt_int))
    assert out_bf16.dtype == jnp.bfloat16
    ref_bf16 = _reference(logits_bf16.astype(jnp.float32), tgt_int)
    assert jnp.allclose(out_bf16.astype(jnp.float32), ref_bf16, atol=2e-2, rtol=2e-2)

    print("KERNEL_OK")
</pallas_src>

<mosaic_0001>
module attributes {stable_mosaic.version = 11 : i64} {
  func.func @_soft_ce_int_kernel(%arg0: i32, %arg1: memref<8x128xf32, #tpu.memory_space<vmem>>, %arg2: memref<8x1xi32, #tpu.memory_space<vmem>>, %arg3: memref<8x128xf32, #tpu.memory_space<vmem>>) attributes {dimension_semantics = [#tpu.dimension_semantics<parallel>], iteration_bounds = array<i64: 1>, scalar_prefetch = 0 : i64, scratch_operands = 0 : i64, tpu.core_type = #tpu.core_type<tc>, window_params = [{transform_indices = @transform_0, window_bounds = array<i64: 8, 128>}, {transform_indices = @transform_1, window_bounds = array<i64: 8, 1>}, {transform_indices = @transform_2, window_bounds = array<i64: 8, 128>}]} {
    %c0 = arith.constant 0 : index
    %c0_0 = arith.constant 0 : index
    %0 = vector.load %arg1[%c0, %c0_0] : memref<8x128xf32, #tpu.memory_space<vmem>>, vector<8x128xf32>
    %cst = arith.constant dense<0xFF800000> : vector<8xf32>
    %1 = vector.multi_reduction <maximumf>, %0, %cst [1] : vector<8x128xf32> to vector<8xf32>
    %2 = vector.shape_cast %1 : vector<8xf32> to vector<8x1xf32>
    %3 = vector.broadcast %2 : vector<8x1xf32> to vector<8x128xf32>
    %4 = arith.subf %0, %3 : vector<8x128xf32>
    %5 = math.exp %4 : vector<8x128xf32>
    %cst_1 = arith.constant dense<0.000000e+00> : vector<8xf32>
    %6 = vector.multi_reduction <add>, %5, %cst_1 [1] : vector<8x128xf32> to vector<8xf32>
    %7 = vector.shape_cast %6 : vector<8xf32> to vector<8x1xf32>
    %8 = math.log %7 : vector<8x1xf32>
    %9 = vector.broadcast %8 : vector<8x1xf32> to vector<8x128xf32>
    %10 = arith.subf %9, %4 : vector<8x128xf32>
    %c0_2 = arith.constant 0 : index
    %c0_3 = arith.constant 0 : index
    %11 = vector.load %arg2[%c0_2, %c0_3] : memref<8x1xi32, #tpu.memory_space<vmem>>, vector<8x1xi32>
    %12 = tpu.iota {dimensions = array<i32: 1>} : vector<8x128xi32>
    %13 = vector.broadcast %11 : vector<8x1xi32> to vector<8x128xi32>
    %14 = arith.cmpi eq, %12, %13 : vector<8x128xi32>
    %cst_4 = arith.constant 0.020955272 : f32
    %cst_5 = arith.constant 0.00770901376 : f32
    %15 = vector.broadcast %cst_4 : f32 to vector<8x128xf32>
    %16 = vector.broadcast %cst_5 : f32 to vector<8x128xf32>
    %17 = arith.select %14, %15, %16 : vector<8x128xi1>, vector<8x128xf32>
    %18 = arith.mulf %17, %10 : vector<8x128xf32>
    %c0_6 = arith.constant 0 : index
    %c0_7 = arith.constant 0 : index
    %19 = vector.load %arg3[%c0_6, %c0_7] : memref<8x128xf32, #tpu.memory_space<vmem>>, vector<8x128xf32>
    tpu.vector_store %arg3[%c0_6, %c0_7], %18 {strides = array<i32>} : memref<8x128xf32, #tpu.memory_space<vmem>>, vector<8x128xf32>,
    return
  }
  func.func @transform_0(%arg0: i32) -> (i32, i32) {
    %c0_i32 = arith.constant 0 : i32
    %c0_i32_0 = arith.constant 0 : i32
    return %arg0, %c0_i32 : i32, i32
  }
  func.func @transform_1(%arg0: i32) -> (i32, i32) {
    %c0_i32 = arith.constant 0 : i32
    %c0_i32_0 = arith.constant 0 : i32
    return %arg0, %c0_i32 : i32, i32
  }
  func.func @transform_2(%arg0: i32) -> (i32, i32) {
    %c0_i32 = arith.constant 0 : i32
    %c0_i32_0 = arith.constant 0 : i32
    return %arg0, %c0_i32 : i32, i32
  }
}

</mosaic_0001>

<bundles_post_ra>
// kernel: tpu_custom_call.1
= control target key start
LH: loop header
LB: loop body
LE: loop exit
PB: predicated region body
PF: predicated region fallthrough
CT: control target
= control target key end

     0   :  { %s111_s0 = inlined_call_operand.vmem [shape: f32[8,128], index: 0, kind: input, shape index: {}]   ;;  %s112_s1 = inlined_call_operand.vmem [shape: s32[8,1], index: 1, kind: input, shape index: {}]   ;;  %s113_s2 = inlined_call_operand.hbm [shape: f32[8,128], index: 2, kind: output, shape index: {}]  }
   0x1   :  { %v12_v0 = vld [vmem:[%s111_s0] sm:$0xff] }
   0x2   :  { %7 = vsyncpa [#allocation3], 0  ;;  %13 = vmax.xlane.f32.xlu0 %v12_v0  ;;  %v23_v1 = vld [vmem:[%s112_s1] sm:$0xff]  ;;  %v84_v2 = vmov 0   ;;  %v24_v7 = vlaneseq  ;;  %v85_v13 = vmov 0.0077090138  }
   0x3   :  { %52 = vset.pattern.permute.xlu1 %v84_v2  ;;  %53 = vset.pattern.permute.xlu0 %v84_v2  ;;  %s86_s0 = smov [#allocation2]   ;;  %s40_s15 = sshll.u32 %s113_s2, 4  ;;  %s41_s15 = int_to_ptr.hbm [resolvable:$true] %s40_s15 }
   0x4   :  { %27 = vperm.xlu1 %52, %v23_v1   ;;  %v25_v9 = vand.u32 127, %v24_v7  ;;  %s38_s1 = sshll.u32 %s86_s0, 4  ;;  %s39_s1 = int_to_ptr.vmem [resolvable:$true] %s38_s1 }
  0x75   :  { %v14_v3 = vpop.xlane.xlu0 %13 }
  0x76   :  { %v15_v4 = vsub.f32 %v12_v0, %v14_v3  ;;  %v28_v10 = vpop.permute.xlu1 %27 }
  0x77   :  { %vm29_vm0 = vcmp.eq.s32.totalorder %v25_v9, %v28_v10 }
  0x78   :  { %v16_v5 = vmul.f32 1.442695, %v15_v4  ;;  %v30_v14 = vsel %vm29_vm0, 0.020955272, %v85_v13 }
  0x7a   :  { %54 = vpow2.f32 %v16_v5 }
  0x80   :  { %v55_v6 = vpop.eup %54 }
  0x81   :  { %18 = vadd.xlane.f32.xlu0 %v55_v6 }
  0xf4   :  { %v19_v8 = vpop.xlane.xlu0 %18 }
  0xf5   :  { %56 = vlog2.f32 %v19_v8 }
  0xfb   :  { %v57_v11 = vpop.eup %56 }
  0xfc   :  { %v21_v12 = vmul.f32 0.6931472, %v57_v11 }
  0xfe   :  { %v22_v15 = vsub.f32 %v21_v12, %v15_v4 }
 0x100   :  { %v31_v16 = vmul.f32 %v30_v14, %v22_v15 }
 0x102   :  { %32 = vst [vmem:[#allocation2] sm:$0xff] %v31_v16 }
 0x103   :  { %43 = dma.vmem_to_hbm [thread:$0]  %s39_s1, 128, %s41_s15, [#allocation3]  }
 0x104   :  { %82 = dma.done.wait [#allocation3], 128  }
 0x105   :  { %83 = vsyncadd [#allocation3], 4294967168 }
 0x106   :  { %48 = vsyncpa [#allocation3], 1 }

</bundles_post_ra>
